<compile_context>
chip_gen: v7x
topology: tpu7x:2x2x1
jax: 0.10.0
libtpu: 0.0.40
codegen_flags: <defaults>
</compile_context>

<pallas_src>
import jax
import jax.numpy as jnp
from jax.experimental import pallas as pl
from jax.experimental.pallas import tpu as pltpu


def _round_up(x, m):
    return (x + m - 1) // m * m


def _lora_kernel(w_ref, a_ref, b_ref, x_ref, o_ref, acc_ref, bx_ref):
    """One (i, j) output tile; k (contraction over in_features) is the inner axis.

    acc += W_tile @ X_tile          (tm x tk x tn, bf16 in / f32 acc)
    bx  += B_tile @ X_tile          (r  x tk x tn)
    last k:  o = acc + A_tile @ bx  (tm x r  x tn)
    """
    k = pl.program_id(2)

    @pl.when(k == 0)
    def _():
        acc_ref[...] = jnp.zeros_like(acc_ref)
        bx_ref[...] = jnp.zeros_like(bx_ref)

    x = x_ref[...]                                   # bf16 tile
    acc_ref[...] += jnp.dot(w_ref[...], x, preferred_element_type=jnp.float32)
    bx_ref[...] += jnp.dot(b_ref[...], x, preferred_element_type=jnp.float32)

    @pl.when(k == pl.num_programs(2) - 1)
    def _():
        lora = jnp.dot(a_ref[...], bx_ref[...].astype(jnp.bfloat16),
                       preferred_element_type=jnp.float32)
        o_ref[...] = (acc_ref[...] + lora).astype(o_ref.dtype)


def lora_forward(weight, a, b, x, *, tm=128, tk=128, tn=128):
    """(weight + a @ b) @ x  — weight:[out,in], a:[out,r], b:[r,in], x:[in,n]."""
    out_f, in_f = weight.shape
    r = a.shape[1]
    n = x.shape[1]

    mp = _round_up(out_f, tm)
    kp = _round_up(in_f, tk)
    np_ = _round_up(n, tn)

    # bf16 MXU operands, zero-padded to tile-aligned shapes (zero K-padding
    # contributes nothing to the contraction; padded M/N rows/cols are sliced off).
    wp = jnp.zeros((mp, kp), jnp.bfloat16).at[:out_f, :in_f].set(weight.astype(jnp.bfloat16))
    ap = jnp.zeros((mp, r), jnp.bfloat16).at[:out_f, :].set(a.astype(jnp.bfloat16))
    bp = jnp.zeros((r, kp), jnp.bfloat16).at[:, :in_f].set(b.astype(jnp.bfloat16))
    xp = jnp.zeros((kp, np_), jnp.bfloat16).at[:in_f, :n].set(x.astype(jnp.bfloat16))

    grid = (mp // tm, np_ // tn, kp // tk)

    out = pl.pallas_call(
        _lora_kernel,
        out_shape=jax.ShapeDtypeStruct((mp, np_), jnp.float32),
        grid_spec=pltpu.PrefetchScalarGridSpec(
            num_scalar_prefetch=0,
            grid=grid,
            in_specs=[
                pl.BlockSpec((tm, tk), lambda i, j, k: (i, k)),   # W
                pl.BlockSpec((tm, r), lambda i, j, k: (i, 0)),    # A  (rank = full dim)
                pl.BlockSpec((r, tk), lambda i, j, k: (0, k)),    # B
                pl.BlockSpec((tk, tn), lambda i, j, k: (k, j)),   # X
            ],
            out_specs=pl.BlockSpec((tm, tn), lambda i, j, k: (i, j)),
            scratch_shapes=[
                pltpu.VMEM((tm, tn), jnp.float32),   # f32 accumulator for W @ X
                pltpu.VMEM((r, tn), jnp.float32),    # f32 accumulator for B @ X
            ],
        ),
        compiler_params=pltpu.CompilerParams(
            dimension_semantics=("parallel", "parallel", "arbitrary"),
        ),
    )(wp, ap, bp, xp)

    return out[:out_f, :n]


if __name__ == "__main__":
    key = jax.random.PRNGKey(0)
    kw, ka, kb, kx = jax.random.split(key, 4)

    # Small, lane-aligned shapes consistent with a LoRA-wrapped nn.Linear.
    out_features, in_features, rank, n_cols = 128, 256, 8, 256

    weight = jax.random.normal(kw, (out_features, in_features), jnp.float32)
    A = jax.random.normal(ka, (out_features, rank), jnp.float32)
    B = jax.random.normal(kb, (rank, in_features), jnp.float32)
    x = jax.random.normal(kx, (in_features, n_cols), jnp.float32)

    out = lora_forward(weight, A, B, x)
    out = jax.block_until_ready(out)

    # Pure-JAX f32 reference of the exact PyTorch forward.
    ref = (weight + A @ B) @ x
    assert out.shape == ref.shape
    rel_err = jnp.max(jnp.abs(out - ref)) / jnp.max(jnp.abs(ref))
    assert rel_err < 1e-2, f"mismatch vs reference: rel err {rel_err}"

    print("KERNEL_OK")
</pallas_src>

<mosaic_0001>
module attributes {stable_mosaic.version = 11 : i64} {
  func.func @_lora_kernel(%arg0: i32, %arg1: i32, %arg2: i32, %arg3: memref<128x128xbf16, #tpu.memory_space<vmem>>, %arg4: memref<128x8xbf16, #tpu.memory_space<vmem>>, %arg5: memref<8x128xbf16, #tpu.memory_space<vmem>>, %arg6: memref<128x128xbf16, #tpu.memory_space<vmem>>, %arg7: memref<128x128xf32, #tpu.memory_space<vmem>>, %arg8: memref<128x128xf32, #tpu.memory_space<vmem>>, %arg9: memref<8x128xf32, #tpu.memory_space<vmem>>) attributes {dimension_semantics = [#tpu.dimension_semantics<parallel>, #tpu.dimension_semantics<parallel>, #tpu.dimension_semantics<arbitrary>], iteration_bounds = array<i64: 1, 2, 2>, scalar_prefetch = 0 : i64, scratch_operands = 2 : i64, tpu.core_type = #tpu.core_type<tc>, window_params = [{transform_indices = @transform_0, window_bounds = array<i64: 128, 128>}, {transform_indices = @transform_1, window_bounds = array<i64: 128, 8>}, {transform_indices = @transform_2, window_bounds = array<i64: 8, 128>}, {transform_indices = @transform_3, window_bounds = array<i64: 128, 128>}, {transform_indices = @transform_4, window_bounds = array<i64: 128, 128>}]} {
    %c0_i32 = arith.constant 0 : i32
    %0 = arith.cmpi eq, %arg2, %c0_i32 : i32
    %1 = arith.extui %0 : i1 to i32
    %c0_i32_0 = arith.constant 0 : i32
    %2 = arith.cmpi ne, %1, %c0_i32_0 : i32
    scf.if %2 {
      %cst_16 = arith.constant 0.000000e+00 : f32
      %17 = vector.broadcast %cst_16 : f32 to vector<128x128xf32>
      %c0_17 = arith.constant 0 : index
      %c0_18 = arith.constant 0 : index
      %18 = vector.load %arg8[%c0_17, %c0_18] : memref<128x128xf32, #tpu.memory_space<vmem>>, vector<128x128xf32>
      tpu.vector_store %arg8[%c0_17, %c0_18], %17 {strides = array<i32>} : memref<128x128xf32, #tpu.memory_space<vmem>>, vector<128x128xf32>,
      %cst_19 = arith.constant 0.000000e+00 : f32
      %19 = vector.broadcast %cst_19 : f32 to vector<8x128xf32>
      %c0_20 = arith.constant 0 : index
      %c0_21 = arith.constant 0 : index
      %20 = vector.load %arg9[%c0_20, %c0_21] : memref<8x128xf32, #tpu.memory_space<vmem>>, vector<8x128xf32>
      tpu.vector_store %arg9[%c0_20, %c0_21], %19 {strides = array<i32>} : memref<8x128xf32, #tpu.memory_space<vmem>>, vector<8x128xf32>,
    } else {
    }
    %c0 = arith.constant 0 : index
    %c0_1 = arith.constant 0 : index
    %3 = vector.load %arg6[%c0, %c0_1] : memref<128x128xbf16, #tpu.memory_space<vmem>>, vector<128x128xbf16>
    %c0_2 = arith.constant 0 : index
    %c0_3 = arith.constant 0 : index
    %4 = vector.load %arg8[%c0_2, %c0_3] : memref<128x128xf32, #tpu.memory_space<vmem>>, vector<128x128xf32>
    %c0_4 = arith.constant 0 : index
    %c0_5 = arith.constant 0 : index
    %5 = vector.load %arg3[%c0_4, %c0_5] : memref<128x128xbf16, #tpu.memory_space<vmem>>, vector<128x128xbf16>
    %cst = arith.constant dense<0.000000e+00> : vector<128x128xf32>
    %6 = tpu.matmul %5, %3, %cst {dimension_numbers = #tpu.dot_dimension_numbers<[1], [0], [0], [1], [0, 0, 1, 1], [], []>} : vector<128x128xbf16>, vector<128x128xbf16>, vector<128x128xf32> -> vector<128x128xf32>
    %7 = arith.addf %4, %6 : vector<128x128xf32>
    %c0_6 = arith.constant 0 : index
    %c0_7 = arith.constant 0 : index
    %8 = vector.load %arg8[%c0_6, %c0_7] : memref<128x128xf32, #tpu.memory_space<vmem>>, vector<128x128xf32>
    tpu.vector_store %arg8[%c0_6, %c0_7], %7 {strides = array<i32>} : memref<128x128xf32, #tpu.memory_space<vmem>>, vector<128x128xf32>,
    %c0_8 = arith.constant 0 : index
    %c0_9 = arith.constant 0 : index
    %9 = vector.load %arg9[%c0_8, %c0_9] : memref<8x128xf32, #tpu.memory_space<vmem>>, vector<8x128xf32>
    %c0_10 = arith.constant 0 : index
    %c0_11 = arith.constant 0 : index
    %10 = vector.load %arg5[%c0_10, %c0_11] : memref<8x128xbf16, #tpu.memory_space<vmem>>, vector<8x128xbf16>
    %cst_12 = arith.constant dense<0.000000e+00> : vector<8x128xf32>
    %11 = tpu.matmul %10, %3, %cst_12 {dimension_numbers = #tpu.dot_dimension_numbers<[1], [0], [0], [1], [0, 0, 1, 1], [], []>} : vector<8x128xbf16>, vector<128x128xbf16>, vector<8x128xf32> -> vector<8x128xf32>
    %12 = arith.addf %9, %11 : vector<8x128xf32>
    %c0_13 = arith.constant 0 : index
    %c0_14 = arith.constant 0 : index
    %13 = vector.load %arg9[%c0_13, %c0_14] : memref<8x128xf32, #tpu.memory_space<vmem>>, vector<8x128xf32>
    tpu.vector_store %arg9[%c0_13, %c0_14], %12 {strides = array<i32>} : memref<8x128xf32, #tpu.memory_space<vmem>>, vector<8x128xf32>,
    %c1_i32 = arith.constant 1 : i32
    %14 = arith.cmpi eq, %arg2, %c1_i32 : i32
    %15 = arith.extui %14 : i1 to i32
    %c0_i32_15 = arith.constant 0 : i32
    %16 = arith.cmpi ne, %15, %c0_i32_15 : i32
    scf.if %16 {
      %c0_16 = arith.constant 0 : index
      %c0_17 = arith.constant 0 : index
      %17 = vector.load %arg4[%c0_16, %c0_17] : memref<128x8xbf16, #tpu.memory_space<vmem>>, vector<128x8xbf16>
      %c0_18 = arith.constant 0 : index
      %c0_19 = arith.constant 0 : index
      %18 = vector.load %arg9[%c0_18, %c0_19] : memref<8x128xf32, #tpu.memory_space<vmem>>, vector<8x128xf32>
      %19 = arith.truncf %18 : vector<8x128xf32> to vector<8x128xbf16>
      %cst_20 = arith.constant dense<0.000000e+00> : vector<128x128xf32>
      %20 = tpu.matmul %17, %19, %cst_20 {dimension_numbers = #tpu.dot_dimension_numbers<[1], [0], [0], [1], [0, 0, 1, 1], [], []>} : vector<128x8xbf16>, vector<8x128xbf16>, vector<128x128xf32> -> vector<128x128xf32>
      %c0_21 = arith.constant 0 : index
      %c0_22 = arith.constant 0 : index
      %21 = vector.load %arg8[%c0_21, %c0_22] : memref<128x128xf32, #tpu.memory_space<vmem>>, vector<128x128xf32>
      %22 = arith.addf %21, %20 : vector<128x128xf32>
      %c0_23 = arith.constant 0 : index
      %c0_24 = arith.constant 0 : index
      %23 = vector.load %arg7[%c0_23, %c0_24] : memref<128x128xf32, #tpu.memory_space<vmem>>, vector<128x128xf32>
      tpu.vector_store %arg7[%c0_23, %c0_24], %22 {strides = array<i32>} : memref<128x128xf32, #tpu.memory_space<vmem>>, vector<128x128xf32>,
    } else {
    }
    return
  }
  func.func @transform_0(%arg0: i32, %arg1: i32, %arg2: i32) -> (i32, i32) {
    %c0_i32 = arith.constant 0 : i32
    return %arg0, %arg2 : i32, i32
  }
  func.func @transform_1(%arg0: i32, %arg1: i32, %arg2: i32) -> (i32, i32) {
    %c0_i32 = arith.constant 0 : i32
    %c0_i32_0 = arith.constant 0 : i32
    return %arg0, %c0_i32 : i32, i32
  }
  func.func @transform_2(%arg0: i32, %arg1: i32, %arg2: i32) -> (i32, i32) {
    %c0_i32 = arith.constant 0 : i32
    %c0_i32_0 = arith.constant 0 : i32
    return %c0_i32, %arg2 : i32, i32
  }
  func.func @transform_3(%arg0: i32, %arg1: i32, %arg2: i32) -> (i32, i32) {
    %c0_i32 = arith.constant 0 : i32
    return %arg2, %arg1 : i32, i32
  }
  func.func @transform_4(%arg0: i32, %arg1: i32, %arg2: i32) -> (i32, i32) {
    %c0_i32 = arith.constant 0 : i32
    return %arg0, %arg1 : i32, i32
  }
}

</mosaic_0001>

<bundles_post_ra>
// kernel: tpu_custom_call.1
= control target key start
LH: loop header
LB: loop body
LE: loop exit
PB: predicated region body
PF: predicated region fallthrough
CT: control target
= control target key end

     0   :  { %s2082_s0 = inlined_call_operand.hbm [shape: bf16[128,256], index: 0, kind: input, shape index: {}]   ;;  %s2083_s1 = inlined_call_operand.vmem [shape: bf16[128,8], index: 1, kind: input, shape index: {}]   ;;  %s2084_s2 = inlined_call_operand.vmem [shape: bf16[8,256], index: 2, kind: input, shape index: {}]   ;;  %s2085_s3 = inlined_call_operand.hbm [shape: bf16[256,256], index: 3, kind: input, shape index: {}]   ;;  %s2086_s4 = inlined_call_operand.hbm [shape: f32[128,256], index: 4, kind: output, shape index: {}]  }
   0x1   :  { %2101 = sst [smem:[#allocation18_spill]] %s2082_s0 }
   0x2   :  { %2102 = sst [smem:[#allocation19_spill]] %s2083_s1 }
   0x3   :  { %2103 = sst [smem:[#allocation20_spill]] %s2086_s4 }
   0x4   :  { %9 = vsyncpa [#allocation5], 0 }
   0x5   :  { %11 = vsyncpa [#allocation5 + $0x1], 0 }
   0x6   :  { %12 = vsyncpa [#allocation8], 0 }
   0x7   :  { %14 = vsyncpa [#allocation8 + $0x1], 0 }
   0x8   :  { %15 = vsyncpa [#allocation6], 0 }
   0x9   :  { %17 = vsyncpa [#allocation6 + $0x1], 0  ;;  %s1637_s15 = smov 0   ;;  %s1639_s16 = smov 0  }
   0xa   :  { %s1641_s17 = smov 0   ;;  %s1643_s18 = smov 0  }
   0xb   :  { %s1645_s19 = smov 0   ;;  %s1647_s20 = smov 0  }
   0xc   :  { %s1649_s21 = smov 0   ;;  %s1651_s22 = smov 0  }
   0xd   :  { %s1653_s23 = smov 0   ;;  %s1655_s24 = smov 0  }
   0xe   :  { %s1657_s25 = smov 0   ;;  %s1659_s26 = smov 0  }
   0xf   :  { %s1661_s27 = smov 0   ;;  %s1663_s28 = smov 0  }
  0x10 LB: > { %2104 = sst [smem:[#allocation13_spill]] %s1578_s23  ;;  %s1061_s29 = sadd.s32 4294967295, %s1598_s28   ;;  %s1598_s28 = sphi %s1663_s28, %s23_s28   ;;  %s1594_s27 = sphi %s1661_s27, %s2153_s27   ;;  %s1590_s26 = sphi %s1659_s26, %s2152_s26   ;;  %s1586_s25 = sphi %s1657_s25, %s2151_s25   ;;  %s1582_s24 = sphi %s1655_s24, %s2150_s24   ;;  %s1578_s23 = sphi %s1653_s23, %s2139_s23   ;;  %s1574_s22 = sphi %s1651_s22, %s2149_s22   ;;  %s1570_s21 = sphi %s1649_s21, %s2148_s21   ;;  %s1566_s20 = sphi %s1647_s20, %s2147_s20   ;;  %s1562_s19 = sphi %s1645_s19, %s2146_s19   ;;  %s1558_s18 = sphi %s1643_s18, %s2145_s18   ;;  %s1554_s17 = sphi %s1641_s17, %s2144_s17   ;;  %s1550_s16 = sphi %s1639_s16, %s2143_s16   ;;  %s1546_s15 = sphi %s1637_s15, %s2142_s15  }
  0x11   : > { %2105 = sst [smem:[#allocation14_spill]] %s1586_s25  ;;  %s35_s30 = sadd.s32 1, %s1590_s26 }
  0x12   : > { %p1707_p0 = scmp.ge.s32.totalorder %s35_s30, 2  ;;  %s51_s6 = sadd.s32 1, %s1578_s23 }
  0x13   : > { %p58_p1 = scmp.ne.s32.totalorder %s1578_s23, %s1574_s22  ;;  %p2091_p2 = scmp.eq.s32.totalorder %s1598_s28, 0 }
  0x14   : > { %s2155_s30 = smov (%p1707_p0, %s35_s30), 0  ;;  %p64_p4 = scmp.ne.s32.totalorder %s1574_s22, %s1570_s21 }
  0x15   : > { %2107 = sst [smem:[#allocation15_spill]] %s2155_s30  ;;  %p1721_p3 = por %p2091_p2, %p58_p1 }
  0x16   : > { %s1728_s8 = ssub.s32 %s1590_s26, %s2155_s30  ;;  %p1730_p5 = scmp.eq.s32.totalorder %s1061_s29, 0 }
  0x17   : > { %p49_p6 = scmp.eq.s32.totalorder %s1728_s8, 0  ;;  %p1735_p7 = scmp.eq.s32.totalorder %s1061_s29, 3 }
  0x18   : > { %s2109_s9 = scalar_select %p1730_p5, 1, 0 }
  0x19   : > { %s2110_s10 = scalar_select %p1735_p7, 1, 0 }
  0x1a   : > { %p1741_p8 = por %p1730_p5, %p64_p4  ;;  %p2090_p9 = scmp.lt.s32.totalorder %s1598_s28, 4 }
  0x1b   : > { %s1746_s12 = scalar_select %p49_p6, %s1578_s23, %s51_s6  }
  0x1c   : > { %s2111_s11 = scalar_select %p1741_p8, 1, 0 }
  0x1d   : > { %2112 = sst [smem:[#allocation16_spill]] %s1746_s12  ;;  %s205_s13 = sand.u32 1, %s1578_s23  }
  0x1e   : > { %s1066_s14 = sshll.u32 %s205_s13, 6  ;;  %s1067_s21 = sshll.u32 %s1590_s26, 6 }
  0x1f   : > { %s2113_s0 = sld [smem:[#allocation18_spill]]  ;;  %s209_s29 = scalar_lea.vmem [#allocation4], %s1066_s14 }
  0x20   : > { %s218_s1 = sshll.u32 %s209_s29, 4  ;;  %p1762_p10 = pnand %p2090_p9, %p1721_p3  ;;  %s1756_s1 = int_to_ptr.vmem [resolvable:$true] %s218_s1 }
  0x21   : > { %s1766_s12 = scalar_lea.sflag [#allocation5], %s205_s13 }
  0x22   : > { %p1390_p12 = pneg %p1762_p10 }
  0x25   : > { %s1754_s25 = scalar_lea.hbm %s2113_s0, %s1067_s21  ;;  %s1393_s7 = scalar_lea.hbm %s2113_s0, 2048 }
  0x26   : > { %s1388_s4 = scalar_lea.hbm %s1754_s25, 1024  ;;  %p1394_p3 = scmp.lt.u32.totalorder %s1754_s25, %s2113_s0 }
  0x27   : > { %p1389_p11 = scmp.ne.s32.totalorder %s1754_s25, %s1388_s4  ;;  %p1395_p4 = scmp.lt.u32.totalorder %s1393_s7, %s1388_s4 }
  0x28   : > { %p1397_p9 = scmp.lt.u32.totalorder %s1388_s4, %s1754_s25 }
  0x29   : > { %p1391_p13 = pnand %p1390_p12, %p1389_p11  ;;  %p1396_p6 = por %p1395_p4, %p1394_p3 }
  0x2b   : > { %p1392_p1 = pneg %p1391_p13  ;;  %p1398_p2 = por %p1397_p9, %p1396_p6 }
  0x2d   : > { %p1399_p8 = pnand %p1398_p2, %p1392_p1 }
  0x2f   : > { %1402 = shalt.err (!%p1399_p8)
}
  0x30   : > { %s1403_s13 = scalar_lea.vmem %s1756_s1, 1024  ;;  %s1600_s30 = smov [#allocation4]  }
  0x31   : > { %p1404_p11 = scmp.ne.s32.totalorder %s1756_s1, %s1403_s13  ;;  %s1408_s14 = sshll.u32 %s1600_s30, 4  ;;  %s1409_s14 = int_to_ptr.vmem [resolvable:$false] %s1408_s14 }
  0x32   : > { %s1410_s21 = scalar_lea.vmem %s1409_s14, 2048  ;;  %p1411_p5 = scmp.lt.s32.totalorder %s1756_s1, %s1409_s14 }
  0x33   : > { %p1406_p13 = pnand %p1404_p11, %p1390_p12  ;;  %p1412_p3 = scmp.lt.s32.totalorder %s1410_s21, %s1403_s13 }
  0x35   : > { %p1407_p7 = pneg %p1406_p13  ;;  %p1413_p4 = por %p1412_p3, %p1411_p5 }
  0x37   : > { %p1414_p9 = pnand %p1413_p4, %p1407_p7 }
  0x39   : > { %1417 = shalt.err (!%p1414_p9)
}
  0x3a   : > { %s2094_s4 = smov 128   ;;  %s2095_s7 = smov 64  }
  0x3b   : > { %s2096_s29 = smov 4   ;;  %p1072_p2 = scmp.ge.s32.totalorder %s1598_s28, 1 }
  0x3c   : > { %1233 = dma.hbm_to_vmem [thread:$0]  (!%p1762_p10), %s1754_s25, 1024, %s1756_s1, %s1766_s12, %s2094_s4, %s2095_s7, %s2096_s29  }
  0x3d   : > { %p256_p5 = scmp.lt.s32.totalorder %s1598_s28, 5  ;;  %s1062_s30 = sadd.s32 4294967294, %s1598_s28  }
  0x3e   : > { %s38_s14 = sadd.s32 1, %s1594_s27  ;;  %s131_s21 = sadd.s32 1, %s1566_s20 }
  0x3f   : > { %p1799_p7 = pnand %p1072_p2, %p256_p5  ;;  %s2157_s14 = smov (!%p1707_p0, %s38_s14), %s1594_s27 }
  0x40   : > { %p138_p8 = scmp.ne.s32.totalorder %s1566_s20, %s1562_s19  ;;  %p144_p10 = scmp.ne.s32.totalorder %s1562_s19, %s1558_s18 }
  0x41   : > { %p40_p12 = scmp.ge.s32.totalorder %s2157_s14, 2  ;;  %s159_s1 = sadd.s32 1, %s1554_s17 }
  0x42   : > { %p2116_p1 = scmp.eq.s32.totalorder %s1598_s28, 0  ;;  %p2118_p11 = scmp.ne.s32.totalorder %s2109_s9, 0 }
  0x43   : > { %s2159_s14 = smov (%p40_p12, %s2157_s14), 0  ;;  %p169_p0 = scmp.ne.s32.totalorder %s1554_s17, %s1550_s16 }
  0x44   : > { %p1816_p6 = por %p138_p8, %p2116_p1  ;;  %p1822_p13 = por %p144_p10, %p2118_p11 }
  0x45   : > { %2120 = sst [smem:[#allocation17_spill]] %s2159_s14  ;;  %p175_p3 = scmp.ne.s32.totalorder %s1550_s16, %s1546_s15 }
  0x46   : > { %s2119_s12 = scalar_select %p1822_p13, 1, 0 }
  0x47   : > { %s127_s18 = ssub.s32 %s1594_s27, %s2159_s14  ;;  %p176_p4 = scmp.eq.s32.totalorder %s1062_s30, 3 }
  0x48   : > { %s128_s5 = sor.u32 %s127_s18, %s1728_s8  ;;  %p157_p9 = scmp.eq.s32.totalorder %s127_s18, 0 }
  0x49   : > { %p129_p2 = scmp.eq.s32.totalorder %s128_s5, 0  ;;  %p2121_p5 = scmp.ne.s32.totalorder %s2110_s10, 0 }
  0x4a   : > { %s1842_s6 = scalar_select %p157_p9, %s1554_s17, %s159_s1  }
  0x4b   : > { %p1837_p8 = por %p2121_p5, %p169_p0  ;;  %p1847_p10 = por %p176_p4, %p175_p3 }
  0x4c   : > { %s1845_s4 = scalar_select %p129_p2, %s1566_s20, %s131_s21  }
  0x4d   : > { %s2122_s9 = scalar_select %p1837_p8, 1, 0 }
  0x4e   : > { %s2123_s7 = scalar_select %p1847_p10, 1, 0 }
  0x4f   : > { %s235_s29 = sand.u32 1, %s1566_s20   ;;  %s1115_s8 = sshll.u32 %s1590_s26, 5 }
  0x50   : > { %s1068_s30 = sshll.u32 %s235_s29, 6  ;;  %s245_s0 = sadd.s32 %s1594_s27, %s1115_s8 }
  0x51   : > { %s239_s14 = scalar_lea.vmem [#allocation7], %s1068_s30  ;;  %s1071_s5 = sshll.u32 %s245_s0, 6 }
  0x52   : > { %s248_s18 = sshll.u32 %s239_s14, 4  ;;  %s1859_s1 = scalar_lea.hbm %s2085_s3, %s1071_s5  ;;  %s1854_s18 = int_to_ptr.vmem [resolvable:$true] %s248_s18 }
  0x53   : > { %p2124_p12 = scmp.lt.s32.totalorder %s1598_s28, 4  ;;  %s1869_s0 = scalar_lea.sflag [#allocation8], %s235_s29 }
  0x54   : > { %s1418_s14 = scalar_lea.hbm %s1859_s1, 1024  ;;  %s1423_s30 = scalar_lea.hbm %s2085_s3, 4096 }
  0x55   : > { %p1865_p1 = pnand %p2124_p12, %p1816_p6  ;;  %p1419_p11 = scmp.ne.s32.totalorder %s1859_s1, %s1418_s14 }
  0x56   : > { %p1424_p6 = scmp.lt.u32.totalorder %s1859_s1, %s2085_s3  ;;  %p1425_p9 = scmp.lt.u32.totalorder %s1423_s30, %s1418_s14 }
  0x57   : > { %p1420_p0 = pneg %p1865_p1  ;;  %p1427_p5 = scmp.lt.u32.totalorder %s1418_s14, %s1859_s1 }
  0x58   : > { %p1426_p2 = por %p1425_p9, %p1424_p6 }
  0x59   : > { %p1421_p3 = pnand %p1420_p0, %p1419_p11 }
  0x5a   : > { %p1428_p12 = por %p1427_p5, %p1426_p2 }
  0x5b   : > { %p1422_p4 = pneg %p1421_p3 }
  0x5d   : > { %p1429_p10 = pnand %p1428_p12, %p1422_p4 }
  0x5f   : > { %1432 = shalt.err (!%p1429_p10)
}
  0x60   : > { %s1433_s29 = scalar_lea.vmem %s1854_s18, 1024  ;;  %s1604_s10 = smov [#allocation7]  }
  0x61   : > { %p1434_p11 = scmp.ne.s32.totalorder %s1854_s18, %s1433_s29  ;;  %s1438_s23 = sshll.u32 %s1604_s10, 4  ;;  %s1439_s23 = int_to_ptr.vmem [resolvable:$false] %s1438_s23 }
  0x62   : > { %s1440_s25 = scalar_lea.vmem %s1439_s23, 2048  ;;  %p1441_p13 = scmp.lt.s32.totalorder %s1854_s18, %s1439_s23 }
  0x63   : > { %p1436_p3 = pnand %p1434_p11, %p1420_p0  ;;  %p1442_p6 = scmp.lt.s32.totalorder %s1440_s25, %s1433_s29 }
  0x65   : > { %p1437_p8 = pneg %p1436_p3  ;;  %p1443_p9 = por %p1442_p6, %p1441_p13 }
  0x67   : > { %p1444_p2 = pnand %p1443_p9, %p1437_p8 }
  0x69   : > { %1447 = shalt.err (!%p1444_p2)
}
  0x6a   : > { %s2126_s14 = smov 4   ;;  %s2127_s30 = smov 64  }
  0x6b   : > { %s2128_s8 = smov 128   ;;  %260 = sbr.rel (%p1799_p7) target bundleno = 648 (0x288), region = 36 }
  0x6c   : > { %1236 = dma.hbm_to_vmem [thread:$0]  (!%p1865_p1), %s1859_s1, 1024, %s1854_s18, %s1869_s0, %s2128_s8, %s2127_s30, %s2126_s14  }
  0x6d   : > { %s262_s5 = sand.u32 (!%p1799_p7), 1, %s1574_s22   ;;  %p2129_p13 = scmp.ne.s32.totalorder (!%p1799_p7), %s2111_s11, 0 }
  0x6e   : > { %s1073_s10 = sshll.u32 (!%p1799_p7), %s262_s5, 6  ;;  %s263_s29 = scalar_lea.sflag (!%p1799_p7), [#allocation5], %s262_s5 }
  0x6f   : > { %s1903_s23 = scalar_lea.vmem (!%p1799_p7), [#allocation4], %s1073_s10 }
  0x72   : > { %1533 = dma.done.wait (%p2129_p13), %s263_s29, 1024  }
  0x73   : > { %1535 = vsyncadd (%p2129_p13), %s263_s29, 4294966272  ;;  %s271_s21 = sand.u32 1, %s1562_s19   ;;  %p2130_p7 = scmp.ne.s32.totalorder %s2119_s12, 0 }
  0x74   : > { %s1074_s25 = sshll.u32 %s271_s21, 6  ;;  %s272_s18 = scalar_lea.sflag [#allocation8], %s271_s21 }
  0x75   : > { %s1910_s1 = scalar_lea.vmem [#allocation7], %s1074_s25 }
  0x76   : > { %1537 = dma.done.wait (%p2130_p7), %s272_s18, 1024  }
  0x77   : > { %1539 = vsyncadd (%p2130_p7), %s272_s18, 4294966272  ;;  %s311_s13 = sand.u32 1, %s1550_s16   ;;  %p321_p8 = scmp.lt.s32.totalorder %s1582_s24, 1 }
  0x78   : > { %s1075_s11 = sshll.u32 %s311_s13, 7  ;;  %p1077_p10 = scmp.ne.s32.totalorder %s1582_s24, 0 }
  0x79   : > { %s322_s0 = scalar_select %p321_p8, %s1582_s24, 1 }
  0x7a   : > { %s1926_s10 = scalar_lea.vmem [#allocation9], %s1075_s11  ;;  %331 = sbr.rel (%p1077_p10) target bundleno = 132 (0x84), region = 48  ;;  %v1605_v0 = vmov (!%p1077_p10), 0.0  }
  0x7b   : > { %s1076_s14 = sshll.u32 %s322_s0, 2  ;;  %332 = vst [vmem:[#allocation2] sm:$0xff] (!%p1077_p10), %v1605_v0  ;;  %333 = vst [vmem:[#allocation2 + $0x8] sm:$0xff] (!%p1077_p10), %v1605_v0 }
  0x7c   : > { %s1924_s5 = scalar_lea.vmem %s2084_s2, %s1076_s14  ;;  %334 = vst [vmem:[#allocation2 + $0x10] sm:$0xff] (!%p1077_p10), %v1605_v0  ;;  %335 = vst [vmem:[#allocation2 + $0x18] sm:$0xff] (!%p1077_p10), %v1605_v0 }
  0x7d   : > { %336 = vst [vmem:[#allocation2 + $0x20] sm:$0xff] (!%p1077_p10), %v1605_v0  ;;  %337 = vst [vmem:[#allocation2 + $0x28] sm:$0xff] (!%p1077_p10), %v1605_v0 }
  0x7e   : > { %338 = vst [vmem:[#allocation2 + $0x30] sm:$0xff] (!%p1077_p10), %v1605_v0  ;;  %339 = vst [vmem:[#allocation2 + $0x38] sm:$0xff] (!%p1077_p10), %v1605_v0 }
  0x7f   : > { %340 = vst [vmem:[#allocation2 + $0x40] sm:$0xff] (!%p1077_p10), %v1605_v0  ;;  %341 = vst [vmem:[#allocation2 + $0x48] sm:$0xff] (!%p1077_p10), %v1605_v0 }
  0x80   : > { %342 = vst [vmem:[#allocation2 + $0x50] sm:$0xff] (!%p1077_p10), %v1605_v0  ;;  %343 = vst [vmem:[#allocation2 + $0x58] sm:$0xff] (!%p1077_p10), %v1605_v0 }
  0x81   : > { %344 = vst [vmem:[#allocation2 + $0x60] sm:$0xff] %v1605_v0  ;;  %345 = vst [vmem:[#allocation2 + $0x68] sm:$0xff] %v1605_v0 }
  0x82   : > { %346 = vst [vmem:[#allocation2 + $0x70] sm:$0xff] %v1605_v0  ;;  %347 = vst [vmem:[#allocation2 + $0x78] sm:$0xff] %v1605_v0 }
  0x83   : > { %348 = vst [vmem:[#allocation3] sm:$0xff] %v1605_v0 }
  0x84 PF: > { %v1364_v1 = vld [vmem:[%s1910_s1] sm:$0xff]   ;;  %v1365_v2 = vld [vmem:[%s1910_s1 + $0x8] sm:$0xff]   ;;  %v1606_v3 = vmov 0.0   ;;  %v1366_v4 = vld [vmem:[%s1910_s1 + $0x10] sm:$0xff]   ;;  %vm1607_vm0 = vmmov 0   ;;  %p1094_p1 = scmp.ne.s32.totalorder %s1582_s24, 1 }
  0x85   : > { %1182 = vmatprep.subr.bf16.mxu1 %v1606_v3  ;;  %1150 = vmatprep.subr.bf16.mxu0 %v1364_v1  ;;  %v1367_v5 = vld [vmem:[%s1910_s1 + $0x18] sm:$0xff]   ;;  %v1372_v6 = vld [vmem:[%s1903_s23] sm:$0xff]   ;;  %v1369_v8 = vld [vmem:[%s1910_s1 + $0x28] sm:$0xff]   ;;  %vm753_vm1 = vcmask (!%p1094_p1), 1043456   ;;  %vm728_vm2 = vcmask (!%p1094_p1), 64512  }
  0x86   : > { %1183 = vmatpush3.bf16.msra.mxu1 %v1364_v1  ;;  %1151 = vmatpush3.bf16.msra.mxu0 %v1364_v1  ;;  %v1368_v7 = vld [vmem:[%s1910_s1 + $0x20] sm:$0xff]   ;;  %v1370_v9 = vld [vmem:[%s1910_s1 + $0x30] sm:$0xff]   ;;  %v1371_v10 = vld [vmem:[%s1910_s1 + $0x38] sm:$0xff]  }
  0x87   : > { %1184 = vmatprep.subr.bf16.mxu1 %v1606_v3  ;;  %1152 = vmatprep.subr.bf16.mxu0 %v1365_v2  ;;  %v1373_v11 = vld [vmem:[%s1903_s23 + $0x8] sm:$0xff]   ;;  %v623_v12 = vld [vmem:[%s1924_s5] sm:$0xf]  ;;  %v1374_v13 = vld [vmem:[%s1903_s23 + $0x10] sm:$0xff]  }
  0x88   : > { %1198 = vmatprep.mubr.msk.bf16.mxu1 %vm1607_vm0, %v1606_v3  ;;  %1166 = vmatprep.mubr.bf16.mxu0 %v1372_v6  ;;  %v1375_v14 = vld [vmem:[%s1903_s23 + $0x18] sm:$0xff]   ;;  %v1376_v15 = vld [vmem:[%s1903_s23 + $0x20] sm:$0xff]   ;;  %v1377_v16 = vld [vmem:[%s1903_s23 + $0x28] sm:$0xff]  }
  0x89   : > { %v1378_v17 = vld [vmem:[%s1903_s23 + $0x30] sm:$0xff]   ;;  %v1379_v18 = vld [vmem:[%s1903_s23 + $0x38] sm:$0xff]   ;;  %v367_v20 = vld [vmem:[#allocation2 + $0x10] sm:$0xff]  ;;  %s2131_s23 = sld [smem:[#allocation19_spill]] (!%p1094_p1) }
  0x8a   : > { %1185 = vmatpush3.bf16.msra.mxu1 %v1365_v2  ;;  %1153 = vmatpush3.bf16.msra.mxu0 %v1365_v2  ;;  %v622_v19 = vld [vmem:[#allocation3] sm:$0xff]  ;;  %v368_v24 = vld [vmem:[#allocation2 + $0x18] sm:$0xff]  ;;  %v366_v29 = vld [vmem:[#allocation2 + $0x8] sm:$0xff] }
  0x8b   : > { %1186 = vmatprep.subr.bf16.mxu1 %v1606_v3  ;;  %1154 = vmatprep.subr.bf16.mxu0 %v1366_v4  ;;  %v365_v21 = vld [vmem:[#allocation2] sm:$0xff]  ;;  %v371_v37 = vld [vmem:[#allocation2 + $0x30] sm:$0xff]  ;;  %v372_v40 = vld [vmem:[#allocation2 + $0x38] sm:$0xff] }
  0x8c   : > { %v369_v38 = vld [vmem:[#allocation2 + $0x20] sm:$0xff]  ;;  %v370_v43 = vld [vmem:[#allocation2 + $0x28] sm:$0xff]  ;;  %v375_v49 = vld [vmem:[#allocation2 + $0x50] sm:$0xff] }
  0x8d   : > { %v373_v50 = vld [vmem:[#allocation2 + $0x40] sm:$0xff]  ;;  %v376_v52 = vld [vmem:[#allocation2 + $0x58] sm:$0xff]  ;;  %v374_v55 = vld [vmem:[#allocation2 + $0x48] sm:$0xff] }
  0x8e   : > { %1187 = vmatpush3.bf16.msra.mxu1 %v1366_v4  ;;  %1155 = vmatpush3.bf16.msra.mxu0 %v1366_v4  ;;  %v379_v61 = vld [vmem:[#allocation2 + $0x70] sm:$0xff]  ;;  %v377_v62 = vld [vmem:[#allocation2 + $0x60] sm:$0xff]  ;;  %v380_v0 = vld [vmem:[#allocation2 + $0x78] sm:$0xff] }
  0x8f   : > { %1188 = vmatprep.subr.bf16.mxu1 %v1606_v3  ;;  %1156 = vmatprep.subr.bf16.mxu0 %v1367_v5  ;;  %s2132_s1 = smov (!%p1094_p1), %s2131_s23 }
  0x92   : > { %1189 = vmatpush3.bf16.msra.mxu1 %v1367_v5  ;;  %1157 = vmatpush3.bf16.msra.mxu0 %v1367_v5 }
  0x93   : > { %1190 = vmatprep.subr.bf16.mxu1 %v1606_v3  ;;  %1158 = vmatprep.subr.bf16.mxu0 %v1368_v7 }
  0x96   : > { %1191 = vmatpush3.bf16.msra.mxu1 %v1368_v7  ;;  %1159 = vmatpush3.bf16.msra.mxu0 %v1368_v7 }
  0x97   : > { %1192 = vmatprep.subr.bf16.mxu1 %v1606_v3  ;;  %1160 = vmatprep.subr.bf16.mxu0 %v1369_v8 }
  0x9a   : > { %1193 = vmatpush3.bf16.msra.mxu1 %v1369_v8  ;;  %1161 = vmatpush3.bf16.msra.mxu0 %v1369_v8 }
  0x9b   : > { %1194 = vmatprep.subr.bf16.mxu1 %v1606_v3  ;;  %1162 = vmatprep.subr.bf16.mxu0 %v1370_v9 }
  0x9e   : > { %1195 = vmatpush3.bf16.msra.mxu1 %v1370_v9  ;;  %1163 = vmatpush3.bf16.msra.mxu0 %v1370_v9 }
  0x9f   : > { %1196 = vmatprep.subr.bf16.mxu1 %v1606_v3  ;;  %1164 = vmatprep.subr.bf16.mxu0 %v1371_v10  ;;  %v378_v3 = vld [vmem:[#allocation2 + $0x68] sm:$0xff] }
  0xa2   : > { %1197 = vmatpush3.bf16.msra.mxu1 %v1371_v10  ;;  %1165 = vmatpush3.bf16.msra.mxu0 %v1371_v10 }
  0xa5   : > { %1199 = vmatmul.mubr.bf16.vlgmr.msra.gmra.mrb[0].mxu1 %v623_v12  ;;  %1167 = vmatmul.mubr.bf16.vlgmr.msra.gmra.mrb[0].mxu0 %v1373_v11  ;;  %v1380_v11 = vld [vmem:[%s2131_s23] sm:$0xff] (!%p1094_p1)  }
  0xa6   : > { %1170 = vmatprep.mubr.bf16.mxu0 %v1374_v13  ;;  %v1381_v12 = vld [vmem:[%s2132_s1 + $0x20] sm:$0xff] (!%p1094_p1)  }
  0xa7   : > { %1212 = vmatprep.mubr.msk.bf16.mxu1 (!%p1094_p1), %vm728_vm2, %v1381_v12 }
  0xad   : > { %1171 = vmatmul.mubr.bf16.gmra.mrb[4].mxu0 %v1375_v14  ;;  %v1382_v14 = vld [vmem:[%s2132_s1 + $0x8] sm:$0xff] (!%p1094_p1)  }
  0xae   : > { %1174 = vmatprep.mubr.bf16.mxu0 %v1376_v15  ;;  %v1383_v15 = vld [vmem:[%s2132_s1 + $0x28] sm:$0xff] (!%p1094_p1)  }
  0xb5   : > { %1175 = vmatmul.mubr.bf16.gmra.mrb[8].mxu0 %v1377_v16  ;;  %v1384_v16 = vld [vmem:[%s2132_s1 + $0x10] sm:$0xff] (!%p1094_p1)  }
  0xb6   : > { %1178 = vmatprep.mubr.bf16.mxu0 %v1378_v17  ;;  %v1385_v17 = vld [vmem:[%s2132_s1 + $0x30] sm:$0xff] (!%p1094_p1)  }
  0xbd   : > { %1179 = vmatmul.mubr.bf16.gmra.mrb[12].mxu0 %v1379_v18  ;;  %v1386_v18 = vld [vmem:[%s2132_s1 + $0x18] sm:$0xff] (!%p1094_p1)  }
  0xbe   : > { %1204 = vmatprep.mubr.msk.bf16.mxu0 (!%p1094_p1), %vm728_vm2, %v1380_v11 }
 0x178   : > { %v658_v22 = vpop.f32.mrb[0].mxu1  ;;  %v1168_v23 = vpop.f32.mrb[0].mxu0 }
 0x179   : > { %v664_v25 = vadd.f32 %v658_v22, %v622_v19  ;;  %v1200_v26 = vpop.f32.mrb[1].mxu1  ;;  %v592_v27 = vadd.f32 %v1168_v23, %v367_v20  ;;  %v527_v28 = vpop.f32.mrb[1].mxu0  ;;  %v1387_v19 = vld [vmem:[%s2132_s1 + $0x38] sm:$0xff] (!%p1094_p1)  }
 0x17a   : > { %v661_v30 = vpop.f32.mrb[2].mxu1  ;;  %v590_v31 = vadd.f32 %v527_v28, %v365_v21  ;;  %v1169_v32 = vpop.f32.mrb[2].mxu0 }
 0x17b   : > { %665 = vst [vmem:[#allocation3] sm:$0xff] %v664_v25  ;;  %v1201_v33 = vpop.f32.mrb[3].mxu1  ;;  %608 = vst [vmem:[#allocation2 + $0x10] sm:$0xff] %v592_v27  ;;  %v593_v34 = vadd.f32 %v1169_v32, %v368_v24  ;;  %v530_v35 = vpop.f32.mrb[3].mxu0 }
 0x17c   : > { %606 = vst [vmem:[#allocation2] sm:$0xff] %v590_v31  ;;  %v591_v36 = vadd.f32 %v530_v35, %v366_v29 }
 0x17d   : > { %609 = vst [vmem:[#allocation2 + $0x18] sm:$0xff] %v593_v34 }
 0x17e   : > { %607 = vst [vmem:[#allocation2 + $0x8] sm:$0xff] %v591_v36 }
 0x180   : > { %v1172_v39 = vpop.f32.mrb[4].mxu0 }
 0x181   : > { %v596_v41 = vadd.f32 %v1172_v39, %v371_v37  ;;  %v543_v42 = vpop.f32.mrb[5].mxu0 }
 0x182   : > { %v594_v44 = vadd.f32 %v543_v42, %v369_v38  ;;  %v1173_v45 = vpop.f32.mrb[6].mxu0  ;;  %v686_v9 = vld [vmem:[#allocation3] sm:$0xff] (!%p1094_p1)  ;;  %v856_v20 = vld [vmem:[#allocation2 + $0x10] sm:$0xff] (!%p1094_p1) }
 0x183   : > { %612 = vst [vmem:[#allocation2 + $0x30] sm:$0xff] %v596_v41  ;;  %v597_v46 = vadd.f32 %v1173_v45, %v372_v40  ;;  %v546_v47 = vpop.f32.mrb[7].mxu0  ;;  %v687_v10 = vpack.c.bf16 (!%p1094_p1), %v686_v9, %v686_v9  ;;  %v854_v22 = vld [vmem:[#allocation2] sm:$0xff] (!%p1094_p1) }
 0x184   : > { %610 = vst [vmem:[#allocation2 + $0x20] sm:$0xff] %v594_v44  ;;  %v595_v48 = vadd.f32 %v546_v47, %v370_v43  ;;  %v857_v26 = vld [vmem:[#allocation2 + $0x18] sm:$0xff] (!%p1094_p1) }
 0x185   : > { %613 = vst [vmem:[#allocation2 + $0x38] sm:$0xff] %v597_v46  ;;  %1222 = vmatprep.subr.msk.bf16.mxu0 (!%p1094_p1), %vm753_vm1, %v687_v10  ;;  %1223 = vmatprep.subr.msk.bf16.mxu1 (!%p1094_p1), %vm753_vm1, %v687_v10  ;;  %v755_v13 = vsel (!%p1094_p1), %vm753_vm1, %v687_v10, 0  ;;  %v855_v32 = vld [vmem:[#allocation2 + $0x8] sm:$0xff] (!%p1094_p1) }
 0x186   : > { %611 = vst [vmem:[#allocation2 + $0x28] sm:$0xff] %v595_v48  ;;  %1203 = vmatpush3.bf16.msra.mxu0 (!%p1094_p1), %v755_v13  ;;  %1221 = vmatpush3.bf16.msra.mxu1 (!%p1094_p1), %v755_v13 }
 0x188   : > { %v1176_v51 = vpop.f32.mrb[8].mxu0 }
 0x189   : > { %v600_v53 = vadd.f32 %v1176_v51, %v375_v49  ;;  %v559_v54 = vpop.f32.mrb[9].mxu0  ;;  %1205 = vmatmul.mubr.msk.bf16.vlgmr.msra.gmra.mrb[0].mxu0 (!%p1094_p1), %vm728_vm2, %v1382_v14  ;;  %1213 = vmatmul.mubr.msk.bf16.vlgmr.msra.gmra.mrb[0].mxu1 (!%p1094_p1), %vm728_vm2, %v1383_v15 }
 0x18a   : > { %v598_v56 = vadd.f32 %v559_v54, %v373_v50  ;;  %v1177_v57 = vpop.f32.mrb[10].mxu0  ;;  %1208 = vmatprep.mubr.msk.bf16.mxu0 (!%p1094_p1), %vm728_vm2, %v1384_v16  ;;  %1216 = vmatprep.mubr.msk.bf16.mxu1 (!%p1094_p1), %vm728_vm2, %v1385_v17  ;;  %v860_v44 = vld [vmem:[#allocation2 + $0x30] sm:$0xff] (!%p1094_p1) }
 0x18b   : > { %616 = vst [vmem:[#allocation2 + $0x50] sm:$0xff] %v600_v53  ;;  %v601_v58 = vadd.f32 %v1177_v57, %v376_v52  ;;  %v562_v59 = vpop.f32.mrb[11].mxu0  ;;  %v858_v46 = vld [vmem:[#allocation2 + $0x20] sm:$0xff] (!%p1094_p1) }
 0x18c   : > { %614 = vst [vmem:[#allocation2 + $0x40] sm:$0xff] %v598_v56  ;;  %v599_v60 = vadd.f32 %v562_v59, %v374_v55  ;;  %v861_v50 = vld [vmem:[#allocation2 + $0x38] sm:$0xff] (!%p1094_p1) }
 0x18d   : > { %617 = vst [vmem:[#allocation2 + $0x58] sm:$0xff] %v601_v58  ;;  %v859_v56 = vld [vmem:[#allocation2 + $0x28] sm:$0xff] (!%p1094_p1) }
 0x18e   : > { %615 = vst [vmem:[#allocation2 + $0x48] sm:$0xff] %v599_v60 }
 0x190   : > { %v1180_v63 = vpop.f32.mrb[12].mxu0  ;;  %669 = sbr.rel (%p1094_p1) target bundleno = 619 (0x26b), region = 52 }
 0x191   : > { %v604_v1 = vadd.f32 %v1180_v63, %v379_v61  ;;  %v575_v2 = vpop.f32.mrb[13].mxu0  ;;  %1209 = vmatmul.mubr.msk.bf16.gmra.mrb[4].mxu0 (!%p1094_p1), %vm728_vm2, %v1386_v18  ;;  %1217 = vmatmul.mubr.msk.bf16.gmra.mrb[4].mxu1 (!%p1094_p1), %vm728_vm2, %v1387_v19 }
 0x192   : > { %v602_v4 = vadd.f32 %v575_v2, %v377_v62  ;;  %v1181_v5 = vpop.f32.mrb[14].mxu0  ;;  %v864_v21 = vld [vmem:[#allocation2 + $0x50] sm:$0xff] (!%p1094_p1) }
 0x193   : > { %620 = vst [vmem:[#allocation2 + $0x70] sm:$0xff] %v604_v1  ;;  %v605_v6 = vadd.f32 %v1181_v5, %v380_v0  ;;  %v578_v7 = vpop.f32.mrb[15].mxu0  ;;  %v862_v23 = vld [vmem:[#allocation2 + $0x40] sm:$0xff] (!%p1094_p1) }
 0x194   : > { %618 = vst [vmem:[#allocation2 + $0x60] sm:$0xff] %v602_v4  ;;  %v603_v8 = vadd.f32 %v578_v7, %v378_v3  ;;  %v865_v27 = vld [vmem:[#allocation2 + $0x58] sm:$0xff] (!%p1094_p1) }
 0x195   : > { %621 = vst [vmem:[#allocation2 + $0x78] sm:$0xff] %v605_v6  ;;  %v863_v33 = vld [vmem:[#allocation2 + $0x48] sm:$0xff] (!%p1094_p1) }
 0x196   : > { %619 = vst [vmem:[#allocation2 + $0x68] sm:$0xff] %v603_v8 }
 0x19a   : > { %v868_v45 = vld [vmem:[#allocation2 + $0x70] sm:$0xff] }
 0x19b   : > { %v866_v47 = vld [vmem:[#allocation2 + $0x60] sm:$0xff] }
 0x19c   : > { %v869_v51 = vld [vmem:[#allocation2 + $0x78] sm:$0xff] }
 0x19d   : > { %v867_v57 = vld [vmem:[#allocation2 + $0x68] sm:$0xff] }
 0x25c   : > { %v1206_v24 = vpop.f32.mrb[0].mxu0  ;;  %v1214_v25 = vpop.f32.mrb[0].mxu1 }
 0x25d   : > { %v872_v28 = vadd.f32 %v1206_v24, %v856_v20  ;;  %v880_v29 = vadd.f32 %v1214_v25, %v864_v21  ;;  %v791_v30 = vpop.f32.mrb[1].mxu0  ;;  %v823_v31 = vpop.f32.mrb[1].mxu1 }
 0x25e   : > { %v870_v34 = vadd.f32 %v854_v22, %v791_v30  ;;  %v878_v35 = vadd.f32 %v862_v23, %v823_v31  ;;  %v1207_v36 = vpop.f32.mrb[2].mxu0  ;;  %v1215_v37 = vpop.f32.mrb[2].mxu1 }
 0x25f   : > { %888 = vst [vmem:[%s1926_s10 + $0x10] sm:$0xff] %v872_v28  ;;  %896 = vst [vmem:[%s1926_s10 + $0x50] sm:$0xff] %v880_v29  ;;  %v873_v38 = vadd.f32 %v1207_v36, %v857_v26  ;;  %v881_v39 = vadd.f32 %v1215_v37, %v865_v27  ;;  %v794_v40 = vpop.f32.mrb[3].mxu0  ;;  %v826_v41 = vpop.f32.mrb[3].mxu1 }
 0x260   : > { %886 = vst [vmem:[%s1926_s10] sm:$0xff] %v870_v34  ;;  %894 = vst [vmem:[%s1926_s10 + $0x40] sm:$0xff] %v878_v35  ;;  %v871_v42 = vadd.f32 %v855_v32, %v794_v40  ;;  %v879_v43 = vadd.f32 %v863_v33, %v826_v41 }
 0x261   : > { %889 = vst [vmem:[%s1926_s10 + $0x18] sm:$0xff] %v873_v38  ;;  %897 = vst [vmem:[%s1926_s10 + $0x58] sm:$0xff] %v881_v39 }
 0x262   : > { %887 = vst [vmem:[%s1926_s10 + $0x8] sm:$0xff] %v871_v42  ;;  %895 = vst [vmem:[%s1926_s10 + $0x48] sm:$0xff] %v879_v43 }
 0x264   : > { %v1210_v48 = vpop.f32.mrb[4].mxu0  ;;  %v1218_v49 = vpop.f32.mrb[4].mxu1 }
 0x265   : > { %v876_v52 = vadd.f32 %v1210_v48, %v860_v44  ;;  %v884_v53 = vadd.f32 %v1218_v49, %v868_v45  ;;  %v807_v54 = vpop.f32.mrb[5].mxu0  ;;  %v839_v55 = vpop.f32.mrb[5].mxu1 }
 0x266   : > { %v874_v58 = vadd.f32 %v858_v46, %v807_v54  ;;  %v882_v59 = vadd.f32 %v866_v47, %v839_v55  ;;  %v1211_v60 = vpop.f32.mrb[6].mxu0  ;;  %v1219_v61 = vpop.f32.mrb[6].mxu1 }
 0x267   : > { %892 = vst [vmem:[%s1926_s10 + $0x30] sm:$0xff] %v876_v52  ;;  %900 = vst [vmem:[%s1926_s10 + $0x70] sm:$0xff] %v884_v53  ;;  %v877_v62 = vadd.f32 %v1211_v60, %v861_v50  ;;  %v885_v63 = vadd.f32 %v1219_v61, %v869_v51  ;;  %v810_v0 = vpop.f32.mrb[7].mxu0  ;;  %v842_v1 = vpop.f32.mrb[7].mxu1 }
 0x268   : > { %890 = vst [vmem:[%s1926_s10 + $0x20] sm:$0xff] %v874_v58  ;;  %898 = vst [vmem:[%s1926_s10 + $0x60] sm:$0xff] %v882_v59  ;;  %v875_v2 = vadd.f32 %v859_v56, %v810_v0  ;;  %v883_v3 = vadd.f32 %v867_v57, %v842_v1 }
 0x269   : > { %893 = vst [vmem:[%s1926_s10 + $0x38] sm:$0xff] %v877_v62  ;;  %901 = vst [vmem:[%s1926_s10 + $0x78] sm:$0xff] %v885_v63 }
 0x26a   : > { %891 = vst [vmem:[%s1926_s10 + $0x28] sm:$0xff] %v875_v2  ;;  %899 = vst [vmem:[%s1926_s10 + $0x68] sm:$0xff] %v883_v3 }
 0x26b PF: > { %s2133_s25 = sld [smem:[#allocation14_spill]]  ;;  %s2134_s0 = sld [smem:[#allocation20_spill]] }
 0x26c   : > { %s918_s30 = sshll.u32 %s1926_s10, 4  ;;  %s2006_s8 = scalar_lea.sflag [#allocation6], %s311_s13  ;;  %s2002_s30 = int_to_ptr.vmem [resolvable:$true] %s918_s30 }
 0x26d   : > { %s1448_s5 = scalar_lea.vmem %s2002_s30, 2048  ;;  %p2135_p4 = scmp.ne.s32.totalorder %s2122_s9, 0 }
 0x26e   : > { %p1449_p0 = scmp.ne.s32.totalorder %s2002_s30, %s1448_s5  ;;  %s1608_s12 = smov [#allocation9]  }
 0x26f   : > { %s1452_s29 = sshll.u32 %s1608_s12, 4  ;;  %s1453_s29 = int_to_ptr.vmem [resolvable:$false] %s1452_s29 }
 0x270   : > { %p1450_p5 = pnand %p1449_p0, %p2135_p4  ;;  %s1454_s23 = scalar_lea.vmem %s1453_s29, 4096 }
 0x271   : > { %s1112_s18 = sshll.u32 %s2133_s25, 7  ;;  %p1455_p11 = scmp.lt.s32.totalorder %s2002_s30, %s1453_s29 }
 0x272   : > { %s1999_s14 = scalar_lea.hbm %s2134_s0, %s1112_s18  ;;  %p1451_p12 = pneg %p1450_p5 }
 0x273   : > { %p1456_p3 = scmp.lt.s32.totalorder %s1454_s23, %s1448_s5 }
 0x275   : > { %p1457_p6 = por %p1456_p3, %p1455_p11 }
 0x277   : > { %p1458_p9 = pnand %p1457_p6, %p1451_p12 }
 0x279   : > { %1461 = shalt.err (!%p1458_p9)
}
 0x27a   : > { %s1462_s13 = scalar_lea.hbm %s1999_s14, 2048  ;;  %s1466_s25 = scalar_lea.hbm %s2134_s0, 4096 }
 0x27b   : > { %p1463_p2 = scmp.ne.s32.totalorder %s1999_s14, %s1462_s13  ;;  %p1467_p8 = scmp.lt.u32.totalorder %s1999_s14, %s2134_s0 }
 0x27c   : > { %p1468_p10 = scmp.lt.u32.totalorder %s1466_s25, %s1462_s13  ;;  %p1470_p0 = scmp.lt.u32.totalorder %s1462_s13, %s1999_s14 }
 0x27d   : > { %p1464_p13 = pnand %p1463_p2, %p2135_p4 }
 0x27e   : > { %p1469_p1 = por %p1468_p10, %p1467_p8 }
 0x27f   : > { %p1465_p7 = pneg %p1464_p13 }
 0x280   : > { %p1471_p5 = por %p1470_p0, %p1469_p1 }
 0x282   : > { %p1472_p12 = pnand %p1471_p5, %p1465_p7 }
 0x284   : > { %1475 = shalt.err (!%p1472_p12)
}
 0x285   : > { %s1609_s24 = smov 128   ;;  %s1610_s5 = smov 256  }
 0x286   : > { %s1611_s12 = smov 8  }
 0x287   : > { %1228 = dma.vmem_to_hbm [thread:$0]  (%p2135_p4), %s2002_s30, 2048, %s1999_s14, %s2006_s8, %s1609_s24, %s1610_s5, %s1611_s12  }
 0x288 PF: > { %p1242_p11 = scmp.ge.s32.totalorder %s1598_s28, 2  ;;  %s933_s29 = sand.u32 1, %s1546_s15  }
 0x289   : > { %p2136_p3 = scmp.ne.s32.totalorder %s2123_s7, 0  ;;  %s934_s23 = scalar_lea.sflag [#allocation6], %s933_s29 }
 0x28b   : > { %p1238_p6 = pnand %p1242_p11, %p2136_p3 }
 0x28d   : > { %1541 = dma.done.wait (!%p1238_p6), %s934_s23, 2048  }
 0x28e   : > { %1543 = vsyncadd (!%p1238_p6), %s934_s23, 4294965248  ;;  %s23_s28 = sadd.s32 1, %s1598_s28   ;;  %s2138_s9 = sld [smem:[#allocation13_spill]] }
 0x28f   : > { %p2035_p9 = scmp.ge.s32.totalorder %s23_s28, 6   ;;  %s2139_s23 = sld [smem:[#allocation16_spill]] }
 0x290   : > { %s2140_s7 = sld [smem:[#allocation15_spill]]  ;;  %s2141_s14 = sld [smem:[#allocation17_spill]] }
 0x291   : > { %s2142_s15 = smov %s1550_s16  ;;  %s2143_s16 = smov %s1554_s17 }
 0x292   : > { %s2144_s17 = smov %s1842_s6  ;;  %s2145_s18 = smov %s1562_s19 }
 0x293   : > { %s2146_s19 = smov %s1566_s20  ;;  %s2147_s20 = smov %s1845_s4 }
 0x294   : > { %s2148_s21 = smov %s1574_s22  ;;  %s2149_s22 = smov %s2138_s9 }
 0x295   : > { %s2150_s24 = smov %s1590_s26  ;;  %s2151_s25 = smov %s1594_s27 }
 0x296   : > { %s2152_s26 = smov %s2140_s7  ;;  %s2153_s27 = smov %s2141_s14 }
 0x297   :  { %22 = sbr.rel (!%p2035_p9) target bundleno = 16 (0x10), region = 108 }
 0x29e   :  { %939 = vsyncpa [#allocation5], 1 }
 0x29f   :  { %941 = vsyncpa [#allocation5 + $0x1], 1 }
 0x2a0   :  { %942 = vsyncpa [#allocation8], 1 }
 0x2a1   :  { %944 = vsyncpa [#allocation8 + $0x1], 1 }
 0x2a2   :  { %945 = vsyncpa [#allocation6], 1 }
 0x2a3   :  { %947 = vsyncpa [#allocation6 + $0x1], 1 }

</bundles_post_ra>
